<compile_context>
chip_gen: v6e
topology: v6e:2x2x1
jax: 0.10.0
libtpu: 0.0.40
codegen_flags: <defaults>
</compile_context>

<pallas_src>
import jax
import jax.numpy as jnp
import numpy as np
from jax import lax
from jax.experimental import pallas as pl
from jax.experimental.pallas import tpu as pltpu


Z_CHARGE_ENERGY = {
    5: {-1: -0.9069259227409529, 0: -0.9067014997308661, 1: -0.8955912585096613},
    35: {-1: -94.6090157909654, 0: -94.604404905443},
    6: {-1: -1.3932418998827225, 0: -1.3916987987479128, 1: -1.3759382381507295},
    20: {2: -24.88112570877957},
    17: {-1: -16.912265570591728, 0: -16.907185460268185},
    9: {-1: -3.672819229197178, 0: -3.6682253180170643},
    1: {-1: -0.01847929557313527, 0: -0.01832997834502815, 1: 0.0},
    53: {-1: -10.950741509446582, 0: -10.94636015721096},
    19: {1: -22.03781924636417},
    3: {1: -0.26775029926726546},
    12: {2: -7.322184135640635},
    7: {-1: -2.0063839463975475, 0: -2.0071399826210214, 1: -1.9867330882457677},
    11: {1: -5.958752782203725},
    8: {-1: -2.763314563434649, 0: -2.7611998823447985, 1: -2.741634050870444},
    15: {0: -12.540610523725608, 1: -12.526828346635186},
    16: {-1: -14.638878157050366, 0: -14.635829845173458, 1: -14.622592033424905},
    14: {-1: -10.636087279353365, 0: -10.63456948425163, 1: -10.62379944847741},
}

_LANES = 128
_CHUNK_ROWS = 32          # 4 vregs of i32 idx + 4 vregs of f32 acc stay register-resident
_MAX_BLOCK_ROWS = 2048    # 2048x128 f32 = 1 MiB per block; in+out double-buffered ~4 MiB
_SPLIT_BLOCK_ROWS = 1024  # once rows >= 2*this, use >=2 grid steps (v7x megacore)


def build_energy_table(z_charge_energy=Z_CHARGE_ENERGY):
    """Mirror of the PyTorch __init__ buffer; also returns the compacted entries."""
    z_max = max(z_charge_energy.keys())
    charge_min = min(min(qs) for qs in z_charge_energy.values())
    charge_max = max(max(qs) for qs in z_charge_energy.values())
    charge_offset = -charge_min
    n_charge = charge_max - charge_min + 1

    table = np.full((z_max + 1, n_charge), np.nan, dtype=np.float32)
    entries = []
    for z, charges in z_charge_energy.items():
        for q, e in charges.items():
            table[z, q + charge_offset] = e
            entries.append((int(z * n_charge + (q + charge_offset)), float(e)))
    entries.sort()
    return jnp.asarray(table), tuple(entries), z_max, charge_offset, n_charge


def _make_lookup_kernel(entries):
    """Kernel factory: entries are baked in as compile-time constants."""

    def kernel(idx_ref, out_ref):
        # idx_ref: (block_rows, 128) int32 VMEM, flat (z, charge) indices, -1 => invalid.
        # out_ref: (block_rows, 128) f32  VMEM, gathered energies, NaN if no match.
        n_chunks = idx_ref.shape[0] // _CHUNK_ROWS

        def body(c, carry):
            r0 = pl.multiple_of(c * _CHUNK_ROWS, _CHUNK_ROWS)
            idx = idx_ref[pl.ds(r0, _CHUNK_ROWS), :]                      # 4 vregs
            acc = jnp.full((_CHUNK_ROWS, _LANES), jnp.nan, dtype=jnp.float32)
            for k_idx, k_val in entries:       # static unroll; constants -> immediates
                acc = jnp.where(idx == k_idx, jnp.float32(k_val), acc)
            out_ref[pl.ds(r0, _CHUNK_ROWS), :] = acc
            return carry

        lax.fori_loop(0, n_chunks, body, 0)

    return kernel


def _bucket_rows(rows_needed):
    """Bucket the padded row count to bound recompiles and last-block waste."""
    rows = max(_CHUNK_ROWS,
               ((rows_needed + _CHUNK_ROWS - 1) // _CHUNK_ROWS) * _CHUNK_ROWS)
    if rows <= 2 * _MAX_BLOCK_ROWS:
        return max(_CHUNK_ROWS, pl.next_power_of_2(rows))
    return ((rows + _MAX_BLOCK_ROWS - 1) // _MAX_BLOCK_ROWS) * _MAX_BLOCK_ROWS


def _choose_block_rows(rows_bucket):
    """Pick a block size that divides rows_bucket; split into >=2 steps when large."""
    if rows_bucket >= 2 * _SPLIT_BLOCK_ROWS:
        return min(_MAX_BLOCK_ROWS, rows_bucket // 2)
    return rows_bucket


class AtomicEnergiesBlock:
    def __init__(self, z_charge_energy=None, validate=False):
        if z_charge_energy is None:
            z_charge_energy = Z_CHARGE_ENERGY
        (self.energy_table, self.entries, self.z_max,
         self.charge_offset, self.n_charge) = build_energy_table(z_charge_energy)
        # validate=True reproduces the PyTorch ValueError (forces a host sync);
        # default False lets NaNs propagate with no per-call device->host readback.
        self.validate = validate
        self._kernel = _make_lookup_kernel(self.entries)
        self._fused = self._build_fused()

    def _build_fused(self):
        kernel = self._kernel
        z_max = self.z_max
        charge_offset = self.charge_offset
        n_charge = self.n_charge

        def fused(z_pad, charge_pad):
            n_pad = z_pad.shape[0]                 # static at trace time
            rows = n_pad // _LANES
            block_rows = _choose_block_rows(rows)  # Python ints, divides rows

            z_i = z_pad.astype(jnp.int32)
            q_i = charge_pad.astype(jnp.int32) + jnp.int32(charge_offset)
            in_range = ((z_i >= 0) & (z_i <= z_max) &
                        (q_i >= 0) & (q_i < n_charge))
            # -1 matches no table entry -> NaN (also prevents bad charges
            # aliasing into an adjacent z row).
            flat_idx = jnp.where(in_range,
                                 z_i * jnp.int32(n_charge) + q_i,
                                 jnp.int32(-1))
            idx2d = flat_idx.reshape(rows, _LANES)

            out2d = pl.pallas_call(
                kernel,
                out_shape=jax.ShapeDtypeStruct((rows, _LANES), jnp.float32),
                grid=(rows // block_rows,),
                in_specs=[pl.BlockSpec((block_rows, _LANES), lambda i: (i, 0))],
                out_specs=pl.BlockSpec((block_rows, _LANES), lambda i: (i, 0)),
                compiler_params=pltpu.CompilerParams(
                    dimension_semantics=("parallel",)),
            )(idx2d)
            return out2d.reshape(-1)

        return jax.jit(fused)

    def __call__(self, z, charge=None):
        if charge is None:
            charge = jnp.zeros_like(z)
        n = int(z.shape[0])
        if n == 0:
            return jnp.zeros((0,), dtype=jnp.float32)

        rows_bucket = _bucket_rows(pl.cdiv(n, _LANES))
        n_pad = rows_bucket * _LANES
        # Pad z with -1 (out of range => NaN in the pad region, sliced off below).
        z_pad = jnp.pad(z, (0, n_pad - n), constant_values=-1)
        charge_pad = jnp.pad(charge, (0, n_pad - n), constant_values=0)

        energies = self._fused(z_pad, charge_pad)[:n]

        if self.validate:
            # TODO(synk): data-dependent ValueError has no device-side equivalent;
            # this forces a host sync, hence opt-in.
            if bool(jnp.isnan(energies).any()):
                raise ValueError(
                    "Some Z/charge combinations are not in the energy table.")
        return energies


if __name__ == "__main__":
    block = AtomicEnergiesBlock()

    # Deterministic inputs drawn from valid (z, charge) pairs.
    valid_pairs = np.array(
        [(z, q) for z, qs in Z_CHARGE_ENERGY.items() for q in qs.keys()],
        dtype=np.int32,
    )
    key = jax.random.PRNGKey(0)
    N = 37
    pick = jax.random.randint(key, (N,), 0, valid_pairs.shape[0])
    pairs = jnp.asarray(valid_pairs)[pick]
    z = pairs[:, 0]
    charge = pairs[:, 1]

    energies = jax.block_until_ready(block(z, charge))

    # Reference: plain JAX advanced indexing of the same (z, charge) table.
    ref = block.energy_table[z, charge + block.charge_offset]
    assert energies.shape == (N,)
    assert energies.dtype == jnp.float32
    np.testing.assert_allclose(np.asarray(energies), np.asarray(ref), rtol=0, atol=0)

    # charge=None default path (neutral atoms).
    z_neutral = jnp.asarray([1, 6, 7, 8, 16], dtype=jnp.int32)
    e_neutral = jax.block_until_ready(block(z_neutral))
    ref_neutral = block.energy_table[z_neutral, block.charge_offset]
    np.testing.assert_allclose(np.asarray(e_neutral), np.asarray(ref_neutral))

    # Larger batch exercises the multi-chunk in-kernel loop (>=2 row chunks).
    N2 = 4200
    pick2 = jax.random.randint(jax.random.PRNGKey(0), (N2,), 0, valid_pairs.shape[0])
    pairs2 = jnp.asarray(valid_pairs)[pick2]
    z2, q2 = pairs2[:, 0], pairs2[:, 1]
    e2 = jax.block_until_ready(block(z2, q2))
    ref2 = block.energy_table[z2, q2 + block.charge_offset]
    np.testing.assert_allclose(np.asarray(e2), np.asarray(ref2), rtol=0, atol=0)

    # Unknown / out-of-range combinations must come back NaN (not 0.0).
    z_bad = jnp.asarray([2, 1, 20, 99], dtype=jnp.int32)   # He unknown, Ca q=-1 unknown, z=99 OOB
    q_bad = jnp.asarray([0, 0, -1, 0], dtype=jnp.int32)
    e_bad = jax.block_until_ready(block(z_bad, q_bad))
    bad_nan = np.isnan(np.asarray(e_bad))
    assert bool(bad_nan[0]) and bool(bad_nan[2]) and bool(bad_nan[3]) and not bool(bad_nan[1])

    # Optional strict-validation path mirrors the PyTorch ValueError.
    strict = AtomicEnergiesBlock(validate=True)
    _ = jax.block_until_ready(strict(z, charge))
    try:
        strict(z_bad, q_bad)
        raise AssertionError("expected ValueError for invalid Z/charge")
    except ValueError:
        pass

    print("KERNEL_OK")
</pallas_src>

<mosaic_0001>
module attributes {stable_mosaic.version = 11 : i64} {
  func.func @kernel(%arg0: i32, %arg1: memref<32x128xi32, #tpu.memory_space<vmem>>, %arg2: memref<32x128xf32, #tpu.memory_space<vmem>>) attributes {dimension_semantics = [#tpu.dimension_semantics<parallel>], iteration_bounds = array<i64: 1>, scalar_prefetch = 0 : i64, scratch_operands = 0 : i64, tpu.core_type = #tpu.core_type<tc>, window_params = [{transform_indices = @transform_0, window_bounds = array<i64: 32, 128>}, {transform_indices = @transform_1, window_bounds = array<i64: 32, 128>}]} {
    %c0_i32 = arith.constant 0 : i32
    %c32_i32 = arith.constant 32 : i32
    %0 = arith.muli %c0_i32, %c32_i32 : i32
    %1 = tpu.assume_multiple %0, 32 : i32
    %2 = arith.index_cast %1 : i32 to index
    %c0 = arith.constant 0 : index
    %3 = vector.load %arg1[%2, %c0] : memref<32x128xi32, #tpu.memory_space<vmem>>, vector<32x128xi32>
    %cst = arith.constant 0x7FC00000 : f32
    %4 = vector.broadcast %cst : f32 to vector<32x128xf32>
    %c4_i32 = arith.constant 4 : i32
    %5 = vector.broadcast %c4_i32 : i32 to vector<32x128xi32>
    %6 = arith.cmpi eq, %3, %5 : vector<32x128xi32>
    %cst_0 = arith.constant -0.0184792951 : f32
    %7 = vector.broadcast %cst_0 : f32 to vector<32x128xf32>
    %8 = arith.select %6, %7, %4 : vector<32x128xi1>, vector<32x128xf32>
    %c5_i32 = arith.constant 5 : i32
    %9 = vector.broadcast %c5_i32 : i32 to vector<32x128xi32>
    %10 = arith.cmpi eq, %3, %9 : vector<32x128xi32>
    %cst_1 = arith.constant -0.018329978 : f32
    %11 = vector.broadcast %cst_1 : f32 to vector<32x128xf32>
    %12 = arith.select %10, %11, %8 : vector<32x128xi1>, vector<32x128xf32>
    %c6_i32 = arith.constant 6 : i32
    %13 = vector.broadcast %c6_i32 : i32 to vector<32x128xi32>
    %14 = arith.cmpi eq, %3, %13 : vector<32x128xi32>
    %cst_2 = arith.constant 0.000000e+00 : f32
    %15 = vector.broadcast %cst_2 : f32 to vector<32x128xf32>
    %16 = arith.select %14, %15, %12 : vector<32x128xi1>, vector<32x128xf32>
    %c14_i32 = arith.constant 14 : i32
    %17 = vector.broadcast %c14_i32 : i32 to vector<32x128xi32>
    %18 = arith.cmpi eq, %3, %17 : vector<32x128xi32>
    %cst_3 = arith.constant -0.267750293 : f32
    %19 = vector.broadcast %cst_3 : f32 to vector<32x128xf32>
    %20 = arith.select %18, %19, %16 : vector<32x128xi1>, vector<32x128xf32>
    %c20_i32 = arith.constant 20 : i32
    %21 = vector.broadcast %c20_i32 : i32 to vector<32x128xi32>
    %22 = arith.cmpi eq, %3, %21 : vector<32x128xi32>
    %cst_4 = arith.constant -0.906925917 : f32
    %23 = vector.broadcast %cst_4 : f32 to vector<32x128xf32>
    %24 = arith.select %22, %23, %20 : vector<32x128xi1>, vector<32x128xf32>
    %c21_i32 = arith.constant 21 : i32
    %25 = vector.broadcast %c21_i32 : i32 to vector<32x128xi32>
    %26 = arith.cmpi eq, %3, %25 : vector<32x128xi32>
    %cst_5 = arith.constant -0.906701505 : f32
    %27 = vector.broadcast %cst_5 : f32 to vector<32x128xf32>
    %28 = arith.select %26, %27, %24 : vector<32x128xi1>, vector<32x128xf32>
    %c22_i32 = arith.constant 22 : i32
    %29 = vector.broadcast %c22_i32 : i32 to vector<32x128xi32>
    %30 = arith.cmpi eq, %3, %29 : vector<32x128xi32>
    %cst_6 = arith.constant -0.895591259 : f32
    %31 = vector.broadcast %cst_6 : f32 to vector<32x128xf32>
    %32 = arith.select %30, %31, %28 : vector<32x128xi1>, vector<32x128xf32>
    %c24_i32 = arith.constant 24 : i32
    %33 = vector.broadcast %c24_i32 : i32 to vector<32x128xi32>
    %34 = arith.cmpi eq, %3, %33 : vector<32x128xi32>
    %cst_7 = arith.constant -1.39324188 : f32
    %35 = vector.broadcast %cst_7 : f32 to vector<32x128xf32>
    %36 = arith.select %34, %35, %32 : vector<32x128xi1>, vector<32x128xf32>
    %c25_i32 = arith.constant 25 : i32
    %37 = vector.broadcast %c25_i32 : i32 to vector<32x128xi32>
    %38 = arith.cmpi eq, %3, %37 : vector<32x128xi32>
    %cst_8 = arith.constant -1.39169884 : f32
    %39 = vector.broadcast %cst_8 : f32 to vector<32x128xf32>
    %40 = arith.select %38, %39, %36 : vector<32x128xi1>, vector<32x128xf32>
    %c26_i32 = arith.constant 26 : i32
    %41 = vector.broadcast %c26_i32 : i32 to vector<32x128xi32>
    %42 = arith.cmpi eq, %3, %41 : vector<32x128xi32>
    %cst_9 = arith.constant -1.3759383 : f32
    %43 = vector.broadcast %cst_9 : f32 to vector<32x128xf32>
    %44 = arith.select %42, %43, %40 : vector<32x128xi1>, vector<32x128xf32>
    %c28_i32 = arith.constant 28 : i32
    %45 = vector.broadcast %c28_i32 : i32 to vector<32x128xi32>
    %46 = arith.cmpi eq, %3, %45 : vector<32x128xi32>
    %cst_10 = arith.constant -2.0063839 : f32
    %47 = vector.broadcast %cst_10 : f32 to vector<32x128xf32>
    %48 = arith.select %46, %47, %44 : vector<32x128xi1>, vector<32x128xf32>
    %c29_i32 = arith.constant 29 : i32
    %49 = vector.broadcast %c29_i32 : i32 to vector<32x128xi32>
    %50 = arith.cmpi eq, %3, %49 : vector<32x128xi32>
    %cst_11 = arith.constant -2.007140e+00 : f32
    %51 = vector.broadcast %cst_11 : f32 to vector<32x128xf32>
    %52 = arith.select %50, %51, %48 : vector<32x128xi1>, vector<32x128xf32>
    %c30_i32 = arith.constant 30 : i32
    %53 = vector.broadcast %c30_i32 : i32 to vector<32x128xi32>
    %54 = arith.cmpi eq, %3, %53 : vector<32x128xi32>
    %cst_12 = arith.constant -1.98673308 : f32
    %55 = vector.broadcast %cst_12 : f32 to vector<32x128xf32>
    %56 = arith.select %54, %55, %52 : vector<32x128xi1>, vector<32x128xf32>
    %c32_i32_13 = arith.constant 32 : i32
    %57 = vector.broadcast %c32_i32_13 : i32 to vector<32x128xi32>
    %58 = arith.cmpi eq, %3, %57 : vector<32x128xi32>
    %cst_14 = arith.constant -2.76331449 : f32
    %59 = vector.broadcast %cst_14 : f32 to vector<32x128xf32>
    %60 = arith.select %58, %59, %56 : vector<32x128xi1>, vector<32x128xf32>
    %c33_i32 = arith.constant 33 : i32
    %61 = vector.broadcast %c33_i32 : i32 to vector<32x128xi32>
    %62 = arith.cmpi eq, %3, %61 : vector<32x128xi32>
    %cst_15 = arith.constant -2.761200e+00 : f32
    %63 = vector.broadcast %cst_15 : f32 to vector<32x128xf32>
    %64 = arith.select %62, %63, %60 : vector<32x128xi1>, vector<32x128xf32>
    %c34_i32 = arith.constant 34 : i32
    %65 = vector.broadcast %c34_i32 : i32 to vector<32x128xi32>
    %66 = arith.cmpi eq, %3, %65 : vector<32x128xi32>
    %cst_16 = arith.constant -2.74163413 : f32
    %67 = vector.broadcast %cst_16 : f32 to vector<32x128xf32>
    %68 = arith.select %66, %67, %64 : vector<32x128xi1>, vector<32x128xf32>
    %c36_i32 = arith.constant 36 : i32
    %69 = vector.broadcast %c36_i32 : i32 to vector<32x128xi32>
    %70 = arith.cmpi eq, %3, %69 : vector<32x128xi32>
    %cst_17 = arith.constant -3.67281914 : f32
    %71 = vector.broadcast %cst_17 : f32 to vector<32x128xf32>
    %72 = arith.select %70, %71, %68 : vector<32x128xi1>, vector<32x128xf32>
    %c37_i32 = arith.constant 37 : i32
    %73 = vector.broadcast %c37_i32 : i32 to vector<32x128xi32>
    %74 = arith.cmpi eq, %3, %73 : vector<32x128xi32>
    %cst_18 = arith.constant -3.66822529 : f32
    %75 = vector.broadcast %cst_18 : f32 to vector<32x128xf32>
    %76 = arith.select %74, %75, %72 : vector<32x128xi1>, vector<32x128xf32>
    %c46_i32 = arith.constant 46 : i32
    %77 = vector.broadcast %c46_i32 : i32 to vector<32x128xi32>
    %78 = arith.cmpi eq, %3, %77 : vector<32x128xi32>
    %cst_19 = arith.constant -5.95875263 : f32
    %79 = vector.broadcast %cst_19 : f32 to vector<32x128xf32>
    %80 = arith.select %78, %79, %76 : vector<32x128xi1>, vector<32x128xf32>
    %c51_i32 = arith.constant 51 : i32
    %81 = vector.broadcast %c51_i32 : i32 to vector<32x128xi32>
    %82 = arith.cmpi eq, %3, %81 : vector<32x128xi32>
    %cst_20 = arith.constant -7.32218409 : f32
    %83 = vector.broadcast %cst_20 : f32 to vector<32x128xf32>
    %84 = arith.select %82, %83, %80 : vector<32x128xi1>, vector<32x128xf32>
    %c56_i32 = arith.constant 56 : i32
    %85 = vector.broadcast %c56_i32 : i32 to vector<32x128xi32>
    %86 = arith.cmpi eq, %3, %85 : vector<32x128xi32>
    %cst_21 = arith.constant -10.6360874 : f32
    %87 = vector.broadcast %cst_21 : f32 to vector<32x128xf32>
    %88 = arith.select %86, %87, %84 : vector<32x128xi1>, vector<32x128xf32>
    %c57_i32 = arith.constant 57 : i32
    %89 = vector.broadcast %c57_i32 : i32 to vector<32x128xi32>
    %90 = arith.cmpi eq, %3, %89 : vector<32x128xi32>
    %cst_22 = arith.constant -10.6345692 : f32
    %91 = vector.broadcast %cst_22 : f32 to vector<32x128xf32>
    %92 = arith.select %90, %91, %88 : vector<32x128xi1>, vector<32x128xf32>
    %c58_i32 = arith.constant 58 : i32
    %93 = vector.broadcast %c58_i32 : i32 to vector<32x128xi32>
    %94 = arith.cmpi eq, %3, %93 : vector<32x128xi32>
    %cst_23 = arith.constant -10.6237993 : f32
    %95 = vector.broadcast %cst_23 : f32 to vector<32x128xf32>
    %96 = arith.select %94, %95, %92 : vector<32x128xi1>, vector<32x128xf32>
    %c61_i32 = arith.constant 61 : i32
    %97 = vector.broadcast %c61_i32 : i32 to vector<32x128xi32>
    %98 = arith.cmpi eq, %3, %97 : vector<32x128xi32>
    %cst_24 = arith.constant -12.5406103 : f32
    %99 = vector.broadcast %cst_24 : f32 to vector<32x128xf32>
    %100 = arith.select %98, %99, %96 : vector<32x128xi1>, vector<32x128xf32>
    %c62_i32 = arith.constant 62 : i32
    %101 = vector.broadcast %c62_i32 : i32 to vector<32x128xi32>
    %102 = arith.cmpi eq, %3, %101 : vector<32x128xi32>
    %cst_25 = arith.constant -12.5268288 : f32
    %103 = vector.broadcast %cst_25 : f32 to vector<32x128xf32>
    %104 = arith.select %102, %103, %100 : vector<32x128xi1>, vector<32x128xf32>
    %c64_i32 = arith.constant 64 : i32
    %105 = vector.broadcast %c64_i32 : i32 to vector<32x128xi32>
    %106 = arith.cmpi eq, %3, %105 : vector<32x128xi32>
    %cst_26 = arith.constant -14.6388779 : f32
    %107 = vector.broadcast %cst_26 : f32 to vector<32x128xf32>
    %108 = arith.select %106, %107, %104 : vector<32x128xi1>, vector<32x128xf32>
    %c65_i32 = arith.constant 65 : i32
    %109 = vector.broadcast %c65_i32 : i32 to vector<32x128xi32>
    %110 = arith.cmpi eq, %3, %109 : vector<32x128xi32>
    %cst_27 = arith.constant -14.6358299 : f32
    %111 = vector.broadcast %cst_27 : f32 to vector<32x128xf32>
    %112 = arith.select %110, %111, %108 : vector<32x128xi1>, vector<32x128xf32>
    %c66_i32 = arith.constant 66 : i32
    %113 = vector.broadcast %c66_i32 : i32 to vector<32x128xi32>
    %114 = arith.cmpi eq, %3, %113 : vector<32x128xi32>
    %cst_28 = arith.constant -14.622592 : f32
    %115 = vector.broadcast %cst_28 : f32 to vector<32x128xf32>
    %116 = arith.select %114, %115, %112 : vector<32x128xi1>, vector<32x128xf32>
    %c68_i32 = arith.constant 68 : i32
    %117 = vector.broadcast %c68_i32 : i32 to vector<32x128xi32>
    %118 = arith.cmpi eq, %3, %117 : vector<32x128xi32>
    %cst_29 = arith.constant -16.9122658 : f32
    %119 = vector.broadcast %cst_29 : f32 to vector<32x128xf32>
    %120 = arith.select %118, %119, %116 : vector<32x128xi1>, vector<32x128xf32>
    %c69_i32 = arith.constant 69 : i32
    %121 = vector.broadcast %c69_i32 : i32 to vector<32x128xi32>
    %122 = arith.cmpi eq, %3, %121 : vector<32x128xi32>
    %cst_30 = arith.constant -16.9071846 : f32
    %123 = vector.broadcast %cst_30 : f32 to vector<32x128xf32>
    %124 = arith.select %122, %123, %120 : vector<32x128xi1>, vector<32x128xf32>
    %c78_i32 = arith.constant 78 : i32
    %125 = vector.broadcast %c78_i32 : i32 to vector<32x128xi32>
    %126 = arith.cmpi eq, %3, %125 : vector<32x128xi32>
    %cst_31 = arith.constant -22.0378189 : f32
    %127 = vector.broadcast %cst_31 : f32 to vector<32x128xf32>
    %128 = arith.select %126, %127, %124 : vector<32x128xi1>, vector<32x128xf32>
    %c83_i32 = arith.constant 83 : i32
    %129 = vector.broadcast %c83_i32 : i32 to vector<32x128xi32>
    %130 = arith.cmpi eq, %3, %129 : vector<32x128xi32>
    %cst_32 = arith.constant -24.8811264 : f32
    %131 = vector.broadcast %cst_32 : f32 to vector<32x128xf32>
    %132 = arith.select %130, %131, %128 : vector<32x128xi1>, vector<32x128xf32>
    %c140_i32 = arith.constant 140 : i32
    %133 = vector.broadcast %c140_i32 : i32 to vector<32x128xi32>
    %134 = arith.cmpi eq, %3, %133 : vector<32x128xi32>
    %cst_33 = arith.constant -94.6090164 : f32
    %135 = vector.broadcast %cst_33 : f32 to vector<32x128xf32>
    %136 = arith.select %134, %135, %132 : vector<32x128xi1>, vector<32x128xf32>
    %c141_i32 = arith.constant 141 : i32
    %137 = vector.broadcast %c141_i32 : i32 to vector<32x128xi32>
    %138 = arith.cmpi eq, %3, %137 : vector<32x128xi32>
    %cst_34 = arith.constant -94.6044082 : f32
    %139 = vector.broadcast %cst_34 : f32 to vector<32x128xf32>
    %140 = arith.select %138, %139, %136 : vector<32x128xi1>, vector<32x128xf32>
    %c212_i32 = arith.constant 212 : i32
    %141 = vector.broadcast %c212_i32 : i32 to vector<32x128xi32>
    %142 = arith.cmpi eq, %3, %141 : vector<32x128xi32>
    %cst_35 = arith.constant -10.9507418 : f32
    %143 = vector.broadcast %cst_35 : f32 to vector<32x128xf32>
    %144 = arith.select %142, %143, %140 : vector<32x128xi1>, vector<32x128xf32>
    %c213_i32 = arith.constant 213 : i32
    %145 = vector.broadcast %c213_i32 : i32 to vector<32x128xi32>
    %146 = arith.cmpi eq, %3, %145 : vector<32x128xi32>
    %cst_36 = arith.constant -10.9463606 : f32
    %147 = vector.broadcast %cst_36 : f32 to vector<32x128xf32>
    %148 = arith.select %146, %147, %144 : vector<32x128xi1>, vector<32x128xf32>
    %149 = arith.index_cast %1 : i32 to index
    %c0_37 = arith.constant 0 : index
    %150 = vector.load %arg2[%149, %c0_37] : memref<32x128xf32, #tpu.memory_space<vmem>>, vector<32x128xf32>
    tpu.vector_store %arg2[%149, %c0_37], %148 {strides = array<i32>} : memref<32x128xf32, #tpu.memory_space<vmem>>, vector<32x128xf32>,
    %c1_i32 = arith.constant 1 : i32
    return
  }
  func.func @transform_0(%arg0: i32) -> (i32, i32) {
    %c0_i32 = arith.constant 0 : i32
    %c0_i32_0 = arith.constant 0 : i32
    return %arg0, %c0_i32 : i32, i32
  }
  func.func @transform_1(%arg0: i32) -> (i32, i32) {
    %c0_i32 = arith.constant 0 : i32
    %c0_i32_0 = arith.constant 0 : i32
    return %arg0, %c0_i32 : i32, i32
  }
}

</mosaic_0001>

<bundles_post_ra>
// kernel: fused.1
= control target key start
LH: loop header
LB: loop body
LE: loop exit
PB: predicated region body
PF: predicated region fallthrough
CT: control target
= control target key end

     0   :  { %v347_v1 = vmov nan   ;;  %s618_s0 = inlined_call_operand.vmem [shape: s32[32,128], index: 0, kind: input, shape index: {}]   ;;  %s619_s1 = inlined_call_operand.hbm [shape: f32[32,128], index: 1, kind: output, shape index: {}]  }
   0x1   :  { %v364_v0 = vld [vmem:[%s618_s0] sm:$0xff] }
   0x2   :  { %vm13_vm0 = vcmp.eq.s32.totalorder %v364_v0, 4  ;;  %vm21_vm1 = vcmp.eq.s32.totalorder %v364_v0, 5  ;;  %vm29_vm2 = vcmp.eq.s32.totalorder %v364_v0, 6  ;;  %vm37_vm3 = vcmp.eq.s32.totalorder %v364_v0, 14 }
   0x3   :  { %v17_v2 = vsel %vm13_vm0, -0.018479295, %v347_v1  ;;  %vm45_vm4 = vcmp.eq.s32.totalorder %v364_v0, 20  ;;  %vm53_vm5 = vcmp.eq.s32.totalorder %v364_v0, 21 }
   0x4   :  { %v25_v3 = vsel %vm21_vm1, -0.018329978, %v17_v2 }
   0x5   :  { %v33_v4 = vsel %vm29_vm2, 0.0, %v25_v3 }
   0x6   :  { %6 = vsyncpa [#allocation3], 0  ;;  %v41_v5 = vsel %vm37_vm3, -0.2677503, %v33_v4  ;;  %vm61_vm6 = vcmp.eq.s32.totalorder %v364_v0, 22  ;;  %vm69_vm7 = vcmp.eq.s32.totalorder %v364_v0, 24 }
   0x7   :  { %v49_v6 = vsel %vm45_vm4, -0.9069259, %v41_v5  ;;  %vm77_vm8 = vcmp.eq.s32.totalorder %v364_v0, 25  ;;  %vm85_vm9 = vcmp.eq.s32.totalorder %v364_v0, 26  ;;  %vm93_vm10 = vcmp.eq.s32.totalorder %v364_v0, 28  ;;  %v384_v10 = vld [vmem:[%s618_s0 + $0x8] sm:$0xff] }
   0x8   :  { %v57_v7 = vsel %vm53_vm5, -0.9067015, %v49_v6  ;;  %vm101_vm11 = vcmp.eq.s32.totalorder %v364_v0, 29  ;;  %vm109_vm12 = vcmp.eq.s32.totalorder %v364_v0, 30  ;;  %vm117_vm13 = vcmp.eq.s32.totalorder %v364_v0, 32  ;;  %v457_v40 = vld [vmem:[%s618_s0 + $0x10] sm:$0xff] }
   0x9   :  { %v65_v8 = vsel %vm61_vm6, -0.89559126, %v57_v7  ;;  %vm125_vm14 = vcmp.eq.s32.totalorder %v364_v0, 33  ;;  %vm133_vm15 = vcmp.eq.s32.totalorder %v364_v0, 34  ;;  %vm141_vm0 = vcmp.eq.s32.totalorder %v364_v0, 36 }
   0xa   :  { %v73_v9 = vsel %vm69_vm7, -1.3932419, %v65_v8  ;;  %vm149_vm1 = vcmp.eq.s32.totalorder %v364_v0, 37  ;;  %vm157_vm2 = vcmp.eq.s32.totalorder %v364_v0, 46  ;;  %vm165_vm3 = vcmp.eq.s32.totalorder %v364_v0, 51 }
   0xb   :  { %v81_v11 = vsel %vm77_vm8, -1.3916988, %v73_v9  ;;  %vm14_vm6 = vcmp.eq.s32.totalorder %v384_v10, 4  ;;  %vm189_vm7 = vcmp.eq.s32.totalorder %v364_v0, 58  ;;  %vm22_vm8 = vcmp.eq.s32.totalorder %v384_v10, 5 }
   0xc   :  { %v89_v12 = vsel %vm85_vm9, -1.3759383, %v81_v11  ;;  %v18_v15 = vsel %vm14_vm6, -0.018479295, %v347_v1  ;;  %vm30_vm9 = vcmp.eq.s32.totalorder %v384_v10, 6  ;;  %vm38_vm5 = vcmp.eq.s32.totalorder %v384_v10, 14 }
   0xd   :  { %v97_v13 = vsel %vm93_vm10, -2.006384, %v89_v12  ;;  %v26_v17 = vsel %vm22_vm8, -0.018329978, %v18_v15  ;;  %vm46_vm4 = vcmp.eq.s32.totalorder %v384_v10, 20  ;;  %vm54_vm6 = vcmp.eq.s32.totalorder %v384_v10, 21 }
   0xe   :  { %v105_v14 = vsel %vm101_vm11, -2.00714, %v97_v13  ;;  %vm205_vm11 = vcmp.eq.s32.totalorder %v364_v0, 62  ;;  %v34_v19 = vsel %vm30_vm9, 0.0, %v26_v17  ;;  %vm62_vm8 = vcmp.eq.s32.totalorder %v384_v10, 22 }
   0xf   :  { %v113_v16 = vsel %vm109_vm12, -1.9867331, %v105_v14  ;;  %vm213_vm12 = vcmp.eq.s32.totalorder %v364_v0, 64  ;;  %v42_v21 = vsel %vm38_vm5, -0.2677503, %v34_v19  ;;  %vm221_vm10 = vcmp.eq.s32.totalorder %v364_v0, 65 }
  0x10   :  { %v121_v18 = vsel %vm117_vm13, -2.7633145, %v113_v16  ;;  %v50_v23 = vsel %vm46_vm4, -0.9069259, %v42_v21  ;;  %vm70_vm13 = vcmp.eq.s32.totalorder %v384_v10, 24  ;;  %vm621_vm4 = vcmp.eq.s32.totalorder %v364_v0, 57 }
  0x11   :  { %v129_v20 = vsel %vm125_vm14, -2.7612, %v121_v18  ;;  %v58_v25 = vsel %vm54_vm6, -0.9067015, %v50_v23  ;;  %vm78_vm14 = vcmp.eq.s32.totalorder %v384_v10, 25  ;;  %vm134_vm6 = vcmp.eq.s32.totalorder %v384_v10, 34 }
  0x12   :  { %v137_v22 = vsel %vm133_vm15, -2.7416341, %v129_v20  ;;  %v66_v27 = vsel %vm62_vm8, -0.89559126, %v58_v25  ;;  %vm86_vm15 = vcmp.eq.s32.totalorder %v384_v10, 26  ;;  %vm620_vm8 = vcmp.eq.s32.totalorder %v364_v0, 56 }
  0x13   :  { %v145_v24 = vsel %vm141_vm0, -3.6728191, %v137_v22  ;;  %v74_v29 = vsel %vm70_vm13, -1.3932419, %v66_v27  ;;  %vm94_vm0 = vcmp.eq.s32.totalorder %v384_v10, 28  ;;  %vm118_vm13 = vcmp.eq.s32.totalorder %v384_v10, 32 }
  0x14   :  { %v153_v26 = vsel %vm149_vm1, -3.6682253, %v145_v24  ;;  %v82_v31 = vsel %vm78_vm14, -1.3916988, %v74_v29  ;;  %vm102_vm1 = vcmp.eq.s32.totalorder %v384_v10, 29  ;;  %vm126_vm14 = vcmp.eq.s32.totalorder %v384_v10, 33 }
  0x15   :  { %v161_v28 = vsel %vm157_vm2, -5.9587526, %v153_v26  ;;  %v90_v33 = vsel %vm86_vm15, -1.3759383, %v82_v31  ;;  %vm110_vm2 = vcmp.eq.s32.totalorder %v384_v10, 30  ;;  %vm142_vm15 = vcmp.eq.s32.totalorder %v384_v10, 36 }
  0x16   :  { %v169_v30 = vsel %vm165_vm3, -7.322184, %v161_v28  ;;  %v98_v35 = vsel %vm94_vm0, -2.006384, %v90_v33  ;;  %vm150_vm5 = vcmp.eq.s32.totalorder %v384_v10, 37  ;;  %vm622_vm9 = vcmp.eq.s32.totalorder %v364_v0, 61 }
  0x17   :  { %v177_v32 = vsel %vm620_vm8, -10.636087, %v169_v30  ;;  %vm277_vm8 = vcmp.eq.s32.totalorder %v364_v0, 141  ;;  %v106_v37 = vsel %vm102_vm1, -2.00714, %v98_v35  ;;  %vm158_vm0 = vcmp.eq.s32.totalorder %v384_v10, 46 }
  0x18   :  { %v185_v34 = vsel %vm621_vm4, -10.634569, %v177_v32  ;;  %v114_v39 = vsel %vm110_vm2, -1.9867331, %v106_v37  ;;  %vm166_vm3 = vcmp.eq.s32.totalorder %v384_v10, 51  ;;  %vm182_vm1 = vcmp.eq.s32.totalorder %v384_v10, 57 }
  0x19   :  { %v193_v36 = vsel %vm189_vm7, -10.623799, %v185_v34  ;;  %v122_v42 = vsel %vm118_vm13, -2.7633145, %v114_v39  ;;  %vm190_vm2 = vcmp.eq.s32.totalorder %v384_v10, 58  ;;  %vm623_vm7 = vcmp.eq.s32.totalorder %v364_v0, 66 }
  0x1a   :  { %v201_v38 = vsel %vm622_vm9, -12.54061, %v193_v36  ;;  %vm174_vm9 = vcmp.eq.s32.totalorder %v384_v10, 56  ;;  %v130_v44 = vsel %vm126_vm14, -2.7612, %v122_v42  ;;  %vm230_vm14 = vcmp.eq.s32.totalorder %v384_v10, 66 }
  0x1b   :  { %v209_v41 = vsel %vm205_vm11, -12.526829, %v201_v38  ;;  %v138_v46 = vsel %vm134_vm6, -2.7416341, %v130_v44  ;;  %vm206_vm11 = vcmp.eq.s32.totalorder %v384_v10, 62  ;;  %vm624_vm4 = vcmp.eq.s32.totalorder %v364_v0, 68 }
  0x1c   :  { %v217_v43 = vsel %vm213_vm12, -14.638878, %v209_v41  ;;  %v146_v48 = vsel %vm142_vm15, -3.6728191, %v138_v46  ;;  %vm222_vm12 = vcmp.eq.s32.totalorder %v384_v10, 65  ;;  %vm15_vm6 = vcmp.eq.s32.totalorder %v457_v40, 4 }
  0x1d   :  { %v225_v45 = vsel %vm221_vm10, -14.63583, %v217_v43  ;;  %v154_v50 = vsel %vm150_vm5, -3.6682253, %v146_v48  ;;  %vm625_vm13 = vcmp.eq.s32.totalorder %v364_v0, 69  ;;  %vm246_vm15 = vcmp.eq.s32.totalorder %v384_v10, 69 }
  0x1e   :  { %v233_v47 = vsel %vm623_vm7, -14.622592, %v225_v45  ;;  %v162_v52 = vsel %vm158_vm0, -5.9587526, %v154_v50  ;;  %v19_v53 = vsel %vm15_vm6, -0.018479295, %v347_v1 }
  0x1f   :  { %v241_v49 = vsel %vm624_vm4, -16.912266, %v233_v47  ;;  %vm626_vm7 = vcmp.eq.s32.totalorder %v364_v0, 78  ;;  %v170_v55 = vsel %vm166_vm3, -7.322184, %v162_v52  ;;  %vm23_vm5 = vcmp.eq.s32.totalorder %v457_v40, 5 }
  0x20   :  { %v249_v51 = vsel %vm625_vm13, -16.907185, %v241_v49  ;;  %vm31_vm4 = vcmp.eq.s32.totalorder %v457_v40, 6  ;;  %vm627_vm10 = vcmp.eq.s32.totalorder %v364_v0, 83  ;;  %v178_v57 = vsel %vm174_vm9, -10.636087, %v170_v55 }
  0x21   :  { %v257_v54 = vsel %vm626_vm7, -22.037819, %v249_v51  ;;  %v27_v58 = vsel %vm23_vm5, -0.018329978, %v19_v53  ;;  %vm628_vm0 = vcmp.eq.s32.totalorder %v364_v0, 140  ;;  %vm39_vm3 = vcmp.eq.s32.totalorder %v457_v40, 14 }
  0x22   :  { %v265_v56 = vsel %vm627_vm10, -24.881126, %v257_v54  ;;  %v186_v60 = vsel %vm182_vm1, -10.634569, %v178_v57  ;;  %v35_v61 = vsel %vm31_vm4, 0.0, %v27_v58  ;;  %vm629_vm13 = vcmp.eq.s32.totalorder %v364_v0, 212 }
  0x23   :  { %v273_v59 = vsel %vm628_vm0, -94.60902, %v265_v56  ;;  %v194_v63 = vsel %vm190_vm2, -10.623799, %v186_v60  ;;  %v43_v2 = vsel %vm39_vm3, -0.2677503, %v35_v61 }
  0x24   :  { %v281_v62 = vsel %vm277_vm8, -94.60441, %v273_v59  ;;  %vm630_vm9 = vcmp.eq.s32.totalorder %v384_v10, 61  ;;  %vm47_vm10 = vcmp.eq.s32.totalorder %v457_v40, 20  ;;  %vm55_vm1 = vcmp.eq.s32.totalorder %v457_v40, 21  ;;  %v557_v30 = vld [vmem:[%s618_s0 + $0x18] sm:$0xff] }
  0x25   :  { %v289_v3 = vsel %vm629_vm13, -10.950742, %v281_v62  ;;  %v202_v4 = vsel %vm630_vm9, -12.54061, %v194_v63  ;;  %vm631_vm6 = vcmp.eq.s32.totalorder %v364_v0, 213  ;;  %vm632_vm8 = vcmp.eq.s32.totalorder %v384_v10, 64 }
  0x26   :  { %v297_v5 = vsel %vm631_vm6, -10.946361, %v289_v3  ;;  %v210_v6 = vsel %vm206_vm11, -12.526829, %v202_v4  ;;  %v51_v7 = vsel %vm47_vm10, -0.9069259, %v43_v2 }
  0x27   :  { %301 = vst [vmem:[#allocation2] sm:$0xff] %v297_v5  ;;  %v218_v8 = vsel %vm632_vm8, -14.638878, %v210_v6  ;;  %v59_v9 = vsel %vm55_vm1, -0.9067015, %v51_v7  ;;  %vm63_vm2 = vcmp.eq.s32.totalorder %v457_v40, 22 }
  0x28   :  { %vm71_vm7 = vcmp.eq.s32.totalorder %v457_v40, 24  ;;  %v226_v11 = vsel %vm222_vm12, -14.63583, %v218_v8  ;;  %v67_v12 = vsel %vm63_vm2, -0.89559126, %v59_v9  ;;  %vm79_vm5 = vcmp.eq.s32.totalorder %v457_v40, 25 }
  0x29   :  { %vm87_vm4 = vcmp.eq.s32.totalorder %v457_v40, 26  ;;  %v234_v0 = vsel %vm230_vm14, -14.622592, %v226_v11  ;;  %vm254_vm11 = vcmp.eq.s32.totalorder %v384_v10, 78  ;;  %v75_v13 = vsel %vm71_vm7, -1.3932419, %v67_v12 }
  0x2a   :  { %vm95_vm0 = vcmp.eq.s32.totalorder %v457_v40, 28  ;;  %vm633_vm3 = vcmp.eq.s32.totalorder %v384_v10, 68  ;;  %vm262_vm13 = vcmp.eq.s32.totalorder %v384_v10, 83  ;;  %v83_v15 = vsel %vm79_vm5, -1.3916988, %v75_v13  ;;  %s348_s0 = smov [#allocation2]  }
  0x2b   :  { %v242_v14 = vsel %vm633_vm3, -16.912266, %v234_v0  ;;  %vm103_vm12 = vcmp.eq.s32.totalorder %v457_v40, 29  ;;  %vm270_vm9 = vcmp.eq.s32.totalorder %v384_v10, 140  ;;  %v91_v17 = vsel %vm87_vm4, -1.3759383, %v83_v15 }
  0x2c   :  { %v250_v16 = vsel %vm246_vm15, -16.907185, %v242_v14  ;;  %vm111_vm14 = vcmp.eq.s32.totalorder %v457_v40, 30  ;;  %vm278_vm10 = vcmp.eq.s32.totalorder %v384_v10, 141  ;;  %v99_v19 = vsel %vm95_vm0, -2.006384, %v91_v17 }
  0x2d   :  { %v258_v18 = vsel %vm254_vm11, -22.037819, %v250_v16  ;;  %vm119_vm1 = vcmp.eq.s32.totalorder %v457_v40, 32  ;;  %vm286_vm6 = vcmp.eq.s32.totalorder %v384_v10, 212  ;;  %v107_v21 = vsel %vm103_vm12, -2.00714, %v99_v19 }
  0x2e   :  { %v266_v20 = vsel %vm262_vm13, -24.881126, %v258_v18  ;;  %vm127_vm8 = vcmp.eq.s32.totalorder %v457_v40, 33  ;;  %vm294_vm15 = vcmp.eq.s32.totalorder %v384_v10, 213  ;;  %v115_v23 = vsel %vm111_vm14, -1.9867331, %v107_v21 }
  0x2f   :  { %v274_v22 = vsel %vm270_vm9, -94.60902, %v266_v20  ;;  %vm135_vm2 = vcmp.eq.s32.totalorder %v457_v40, 34  ;;  %v123_v25 = vsel %vm119_vm1, -2.7633145, %v115_v23  ;;  %vm143_vm7 = vcmp.eq.s32.totalorder %v457_v40, 36 }
  0x30   :  { %v282_v24 = vsel %vm278_vm10, -94.60441, %v274_v22  ;;  %v131_v27 = vsel %vm127_vm8, -2.7612, %v123_v25  ;;  %vm151_vm5 = vcmp.eq.s32.totalorder %v457_v40, 37  ;;  %vm159_vm4 = vcmp.eq.s32.totalorder %v457_v40, 46 }
  0x31   :  { %v290_v26 = vsel %vm286_vm6, -10.950742, %v282_v24  ;;  %v139_v29 = vsel %vm135_vm2, -2.7416341, %v131_v27  ;;  %vm167_vm11 = vcmp.eq.s32.totalorder %v457_v40, 51  ;;  %vm175_vm0 = vcmp.eq.s32.totalorder %v457_v40, 56 }
  0x32   :  { %v298_v28 = vsel %vm294_vm15, -10.946361, %v290_v26  ;;  %v147_v10 = vsel %vm143_vm7, -3.6728191, %v139_v29  ;;  %vm183_vm3 = vcmp.eq.s32.totalorder %v457_v40, 57  ;;  %vm191_vm13 = vcmp.eq.s32.totalorder %v457_v40, 58 }
  0x33   :  { %302 = vst [vmem:[#allocation2 + $0x8] sm:$0xff] %v298_v28  ;;  %v155_v31 = vsel %vm151_vm5, -3.6682253, %v147_v10  ;;  %vm199_vm12 = vcmp.eq.s32.totalorder %v457_v40, 61  ;;  %vm16_vm9 = vcmp.eq.s32.totalorder %v557_v30, 4  ;;  %vm24_vm14 = vcmp.eq.s32.totalorder %v557_v30, 5 }
  0x34   :  { %v163_v32 = vsel %vm159_vm4, -5.9587526, %v155_v31  ;;  %v20_v34 = vsel %vm16_vm9, -0.018479295, %v347_v1  ;;  %vm32_vm10 = vcmp.eq.s32.totalorder %v557_v30, 6  ;;  %vm40_vm1 = vcmp.eq.s32.totalorder %v557_v30, 14 }
  0x35   :  { %v171_v33 = vsel %vm167_vm11, -7.322184, %v163_v32  ;;  %v28_v36 = vsel %vm24_vm14, -0.018329978, %v20_v34  ;;  %vm48_vm6 = vcmp.eq.s32.totalorder %v557_v30, 20  ;;  %vm207_vm8 = vcmp.eq.s32.totalorder %v457_v40, 62 }
  0x36   :  { %v179_v35 = vsel %vm175_vm0, -10.636087, %v171_v33  ;;  %v36_v38 = vsel %vm32_vm10, 0.0, %v28_v36  ;;  %vm56_vm15 = vcmp.eq.s32.totalorder %v557_v30, 21  ;;  %vm215_vm2 = vcmp.eq.s32.totalorder %v457_v40, 64  ;;  %s310_s14 = sshll.u32 %s348_s0, 4  ;;  %s311_s14 = int_to_ptr.vmem [resolvable:$true] %s310_s14 }
  0x37   :  { %v187_v37 = vsel %vm183_vm3, -10.634569, %v179_v35  ;;  %v44_v1 = vsel %vm40_vm1, -0.2677503, %v36_v38  ;;  %vm64_vm7 = vcmp.eq.s32.totalorder %v557_v30, 22  ;;  %vm223_vm5 = vcmp.eq.s32.totalorder %v457_v40, 65  ;;  %p330_p1 = scmp.lt.s32.totalorder %s311_s14, %s311_s14 }
  0x38   :  { %v195_v39 = vsel %vm191_vm13, -10.623799, %v187_v37  ;;  %v52_v42 = vsel %vm48_vm6, -0.9069259, %v44_v1  ;;  %vm72_vm4 = vcmp.eq.s32.totalorder %v557_v30, 24  ;;  %vm231_vm11 = vcmp.eq.s32.totalorder %v457_v40, 66 }
  0x39   :  { %v203_v41 = vsel %vm199_vm12, -12.54061, %v195_v39  ;;  %v60_v44 = vsel %vm56_vm15, -0.9067015, %v52_v42  ;;  %vm80_vm0 = vcmp.eq.s32.totalorder %v557_v30, 25  ;;  %vm239_vm3 = vcmp.eq.s32.totalorder %v457_v40, 68 }
  0x3a   :  { %v211_v43 = vsel %vm207_vm8, -12.526829, %v203_v41  ;;  %v68_v46 = vsel %vm64_vm7, -0.89559126, %v60_v44  ;;  %vm88_vm13 = vcmp.eq.s32.totalorder %v557_v30, 26  ;;  %vm247_vm12 = vcmp.eq.s32.totalorder %v457_v40, 69 }
  0x3b   :  { %v219_v45 = vsel %vm215_vm2, -14.638878, %v211_v43  ;;  %v76_v48 = vsel %vm72_vm4, -1.3932419, %v68_v46  ;;  %vm96_vm9 = vcmp.eq.s32.totalorder %v557_v30, 28  ;;  %vm255_vm14 = vcmp.eq.s32.totalorder %v457_v40, 78 }
  0x3c   :  { %v227_v47 = vsel %vm223_vm5, -14.63583, %v219_v45  ;;  %v84_v50 = vsel %vm80_vm0, -1.3916988, %v76_v48  ;;  %vm104_vm10 = vcmp.eq.s32.totalorder %v557_v30, 29  ;;  %vm263_vm1 = vcmp.eq.s32.totalorder %v457_v40, 83 }
  0x3d   :  { %v235_v49 = vsel %vm231_vm11, -14.622592, %v227_v47  ;;  %v92_v52 = vsel %vm88_vm13, -1.3759383, %v84_v50  ;;  %vm112_vm6 = vcmp.eq.s32.totalorder %v557_v30, 30  ;;  %vm271_vm8 = vcmp.eq.s32.totalorder %v457_v40, 140 }
  0x3e   :  { %v243_v51 = vsel %vm239_vm3, -16.912266, %v235_v49  ;;  %v100_v54 = vsel %vm96_vm9, -2.006384, %v92_v52  ;;  %vm120_vm15 = vcmp.eq.s32.totalorder %v557_v30, 32  ;;  %vm279_vm2 = vcmp.eq.s32.totalorder %v457_v40, 141 }
  0x3f   :  { %v251_v53 = vsel %vm247_vm12, -16.907185, %v243_v51  ;;  %v108_v56 = vsel %vm104_vm10, -2.00714, %v100_v54  ;;  %vm128_vm7 = vcmp.eq.s32.totalorder %v557_v30, 33  ;;  %vm287_vm5 = vcmp.eq.s32.totalorder %v457_v40, 212 }
  0x40   :  { %v259_v55 = vsel %vm255_vm14, -22.037819, %v251_v53  ;;  %v116_v58 = vsel %vm112_vm6, -1.9867331, %v108_v56  ;;  %vm136_vm4 = vcmp.eq.s32.totalorder %v557_v30, 34  ;;  %vm295_vm11 = vcmp.eq.s32.totalorder %v457_v40, 213 }
  0x41   :  { %v267_v57 = vsel %vm263_vm1, -24.881126, %v259_v55  ;;  %v124_v60 = vsel %vm120_vm15, -2.7633145, %v116_v58  ;;  %vm144_vm0 = vcmp.eq.s32.totalorder %v557_v30, 36  ;;  %vm152_vm3 = vcmp.eq.s32.totalorder %v557_v30, 37 }
  0x42   :  { %v275_v59 = vsel %vm271_vm8, -94.60902, %v267_v57  ;;  %v132_v62 = vsel %vm128_vm7, -2.7612, %v124_v60  ;;  %vm160_vm13 = vcmp.eq.s32.totalorder %v557_v30, 46  ;;  %vm168_vm12 = vcmp.eq.s32.totalorder %v557_v30, 51 }
  0x43   :  { %v283_v61 = vsel %vm279_vm2, -94.60441, %v275_v59  ;;  %v140_v2 = vsel %vm136_vm4, -2.7416341, %v132_v62  ;;  %vm176_vm9 = vcmp.eq.s32.totalorder %v557_v30, 56  ;;  %vm184_vm14 = vcmp.eq.s32.totalorder %v557_v30, 57 }
  0x44   :  { %v291_v63 = vsel %vm287_vm5, -10.950742, %v283_v61  ;;  %v148_v4 = vsel %vm144_vm0, -3.6728191, %v140_v2  ;;  %vm192_vm10 = vcmp.eq.s32.totalorder %v557_v30, 58  ;;  %vm200_vm1 = vcmp.eq.s32.totalorder %v557_v30, 61 }
  0x45   :  { %v299_v3 = vsel %vm295_vm11, -10.946361, %v291_v63  ;;  %v156_v5 = vsel %vm152_vm3, -3.6682253, %v148_v4  ;;  %vm208_vm6 = vcmp.eq.s32.totalorder %v557_v30, 62  ;;  %vm216_vm8 = vcmp.eq.s32.totalorder %v557_v30, 64 }
  0x46   :  { %303 = vst [vmem:[#allocation2 + $0x10] sm:$0xff] %v299_v3  ;;  %v164_v40 = vsel %vm160_vm13, -5.9587526, %v156_v5  ;;  %vm224_vm15 = vcmp.eq.s32.totalorder %v557_v30, 65  ;;  %vm232_vm2 = vcmp.eq.s32.totalorder %v557_v30, 66  ;;  %vm240_vm7 = vcmp.eq.s32.totalorder %v557_v30, 68 }
  0x47   :  { %v172_v6 = vsel %vm168_vm12, -7.322184, %v164_v40  ;;  %vm248_vm5 = vcmp.eq.s32.totalorder %v557_v30, 69  ;;  %vm256_vm4 = vcmp.eq.s32.totalorder %v557_v30, 78  ;;  %vm264_vm11 = vcmp.eq.s32.totalorder %v557_v30, 83  ;;  %s325_s15 = scalar_lea.vmem %s311_s14, 512 }
  0x48   :  { %v180_v7 = vsel %vm176_vm9, -10.636087, %v172_v6  ;;  %vm272_vm0 = vcmp.eq.s32.totalorder %v557_v30, 140  ;;  %vm280_vm3 = vcmp.eq.s32.totalorder %v557_v30, 141  ;;  %vm288_vm13 = vcmp.eq.s32.totalorder %v557_v30, 212  ;;  %p326_p0 = scmp.ne.s32.totalorder %s311_s14, %s325_s15  ;;  %p331_p2 = scmp.lt.s32.totalorder %s325_s15, %s325_s15 }
  0x49   :  { %v188_v8 = vsel %vm184_vm14, -10.634569, %v180_v7  ;;  %vm296_vm12 = vcmp.eq.s32.totalorder %v557_v30, 213 }
  0x4a   :  { %v196_v9 = vsel %vm192_vm10, -10.623799, %v188_v8  ;;  %p332_p3 = por %p331_p2, %p330_p1 }
  0x4b   :  { %v204_v11 = vsel %vm200_vm1, -12.54061, %v196_v9 }
  0x4c   :  { %v212_v12 = vsel %vm208_vm6, -12.526829, %v204_v11  ;;  %p333_p4 = pnand %p332_p3, %p326_p0 }
  0x4d   :  { %v220_v0 = vsel %vm216_vm8, -14.638878, %v212_v12 }
  0x4e   :  { %v228_v13 = vsel %vm224_vm15, -14.63583, %v220_v0 }
  0x4f   :  { %v236_v14 = vsel %vm232_vm2, -14.622592, %v228_v13 }
  0x50   :  { %v244_v15 = vsel %vm240_vm7, -16.912266, %v236_v14 }
  0x51   :  { %v252_v16 = vsel %vm248_vm5, -16.907185, %v244_v15 }
  0x52   :  { %v260_v17 = vsel %vm256_vm4, -22.037819, %v252_v16 }
  0x53   :  { %v268_v18 = vsel %vm264_vm11, -24.881126, %v260_v17 }
  0x54   :  { %v276_v19 = vsel %vm272_vm0, -94.60902, %v268_v18 }
  0x55   :  { %v284_v20 = vsel %vm280_vm3, -94.60441, %v276_v19 }
  0x56   :  { %v292_v21 = vsel %vm288_vm13, -10.950742, %v284_v20 }
  0x57   :  { %v300_v22 = vsel %vm296_vm12, -10.946361, %v292_v21 }
  0x58   :  { %304 = vst [vmem:[#allocation2 + $0x18] sm:$0xff] %v300_v22 }
  0x59   :  { %336 = shalt.err (!%p333_p4)
}
  0x5a   :  { %s349_s16 = smov 128   ;;  %s350_s17 = smov 8  }
  0x5b   :  { %316 = dma.vmem_to_hbm [thread:$0]  %s311_s14, 512, %s619_s1, [#allocation3], %s349_s16, %s349_s16, %s350_s17  }
  0x5c   :  { %345 = dma.done.wait [#allocation3], 512  }
  0x5d   :  { %346 = vsyncadd [#allocation3], 4294966784 }
  0x5e   :  { %320 = vsyncpa [#allocation3], 1 }

</bundles_post_ra>
